<compile_context>
chip_gen: v7x
topology: tpu7x:2x2x1
jax: 0.10.0
libtpu: 0.0.40
codegen_flags: <defaults>
</compile_context>

<pallas_src>
import functools
from typing import Set

import jax
import jax.numpy as jnp
from jax.experimental import pallas as pl
from jax.experimental.pallas import tpu as pltpu


# ----------------------------------------------------------------------------
# small helpers
# ----------------------------------------------------------------------------
def _round_up(x, m):
    return ((x + m - 1) // m) * m


def _pad2d(arr, shape):
    return jnp.pad(arr, [(0, s - d) for d, s in zip(arr.shape, shape)])


_VMEM_CAP_BYTES = None


def _vmem_cap_bytes():
    """Physical VMEM of the local TPU generation (fallback 64 MiB = safe everywhere)."""
    global _VMEM_CAP_BYTES
    if _VMEM_CAP_BYTES is None:
        try:
            _VMEM_CAP_BYTES = int(pltpu.get_tpu_info().vmem_capacity_bytes)
        except Exception:
            _VMEM_CAP_BYTES = 64 * 1024 * 1024
    return _VMEM_CAP_BYTES


def _vmem_budgets():
    """(compiler scoped-VMEM limit, budget our double-buffered tiles may consume)."""
    cap = _vmem_cap_bytes()
    vmem_limit = min(int(cap * 0.85), 100 * 1024 * 1024)   # ~54 MiB on v7x, ~100 MiB on v5e/v6e
    tile_budget = int(vmem_limit * 0.72)                    # headroom for compiler scratch
    return vmem_limit, tile_budget


def _choose_tm(T, cap, mult):
    """Token tile <= cap, multiple of `mult`, splitting T as evenly as possible
    (avoids computing nearly-empty padded token tiles)."""
    cap = max(mult, (cap // mult) * mult)
    if T <= cap:
        return _round_up(T, mult)
    n_tiles = -(-T // cap)
    return _round_up(-(-T // n_tiles), mult)


def _select_tiles(T, D_pad, I_pad, Do_pad, itemsize, n_w1_streams, tile_budget):
    """Pick (tm, ti): prefer the largest token tile (weight-stream arithmetic
    intensity ~ tm), then the weight-resident ti = I_pad fast path, then the
    largest ti that still fits the VMEM budget."""
    mult = 16 if itemsize < 4 else 8          # bf16 packs 2 rows per sublane
    ti_cands = [I_pad] + [c for c in (2048, 1024, 512, 256, 128)
                          if c < I_pad and I_pad % c == 0]

    def est(tm, ti):
        # conservative: x / weights / output double-buffered, fp32 acc single.
        in_b = 2 * (tm * D_pad + n_w1_streams * D_pad * ti + ti * Do_pad) * itemsize
        bias_b = 2 * (ti + Do_pad) * 4
        out_b = 2 * tm * Do_pad * itemsize
        acc_b = tm * Do_pad * 4
        return in_b + bias_b + out_b + acc_b

    for cap in (512, 384, 256, 192, 128, 64, 32, 16, 8):
        tm = _choose_tm(T, cap, mult)
        for ti in ti_cands:
            if est(tm, ti) <= tile_budget:
                return tm, ti
    return _choose_tm(T, mult, mult), ti_cands[-1]   # safety net


# ----------------------------------------------------------------------------
# Pallas kernels
# ----------------------------------------------------------------------------
def _gpt2_mlp_kernel(x_ref, w1_ref, b1_ref, w2_ref, b2_ref, o_ref, acc_ref):
    # x:[tm,D]  w1:[D,ti]  b1(f32):[1,ti]  w2:[ti,Do]  b2(f32):[1,Do]  o:[tm,Do]  acc:[tm,Do] f32
    k = pl.program_id(1)

    @pl.when(k == 0)
    def _init():
        acc_ref[...] = jnp.zeros_like(acc_ref)

    # Native-dtype tiles go straight to the MXU; accumulate in fp32.
    h = jnp.dot(x_ref[...], w1_ref[...], preferred_element_type=jnp.float32)
    h = h + b1_ref[...]
    # GPT-2 NewGELU (tanh approximation), factored to trim one VALU multiply;
    # tanh goes to the EUP slot.
    h_sq = h * h
    h = 0.5 * h * (1.0 + jnp.tanh(h * (0.7978845608028654 + 0.035677408136300125 * h_sq)))
    acc_ref[...] += jnp.dot(h.astype(w2_ref.dtype), w2_ref[...],
                            preferred_element_type=jnp.float32)

    @pl.when(k == pl.num_programs(1) - 1)
    def _finalize():
        o_ref[...] = (acc_ref[...] + b2_ref[...]).astype(o_ref.dtype)


def _llama_mlp_kernel(x_ref, wgu_ref, wd_ref, o_ref, acc_ref):
    # x:[tm,D]  wgu:[2,D,ti] (gate,up stacked -> one DMA stream)  wd:[ti,Do]
    # o:[tm,Do]  acc:[tm,Do] f32
    k = pl.program_id(1)

    @pl.when(k == 0)
    def _init():
        acc_ref[...] = jnp.zeros_like(acc_ref)

    x = x_ref[...]
    g = jnp.dot(x, wgu_ref[0], preferred_element_type=jnp.float32)
    u = jnp.dot(x, wgu_ref[1], preferred_element_type=jnp.float32)
    h = (g * jax.lax.logistic(g)) * u              # SiLU(gate) * up, in fp32
    acc_ref[...] += jnp.dot(h.astype(wd_ref.dtype), wd_ref[...],
                            preferred_element_type=jnp.float32)

    @pl.when(k == pl.num_programs(1) - 1)
    def _finalize():
        o_ref[...] = acc_ref[...].astype(o_ref.dtype)


# ----------------------------------------------------------------------------
# jitted forwards (reshape/cast/pad of x happens inside the jit so XLA fuses it)
# ----------------------------------------------------------------------------
@functools.partial(jax.jit, static_argnames=("out_dim", "tm", "ti", "vmem_limit"))
def gpt2_mlp_forward(x, w1_t, b1, w2_t, b2, *, out_dim, tm, ti, vmem_limit):
    B, S, D = x.shape
    T = B * S
    D_pad, I_pad = w1_t.shape
    Do_pad = w2_t.shape[1]
    T_pad = _round_up(T, tm)

    x_p = _pad2d(x.reshape(T, D).astype(w1_t.dtype), (T_pad, D_pad))

    y = pl.pallas_call(
        _gpt2_mlp_kernel,
        out_shape=jax.ShapeDtypeStruct((T_pad, Do_pad), w1_t.dtype),
        grid=(T_pad // tm, I_pad // ti),
        in_specs=[
            pl.BlockSpec((tm, D_pad), lambda i, k: (i, 0)),
            pl.BlockSpec((D_pad, ti), lambda i, k: (0, k)),
            pl.BlockSpec((1, ti), lambda i, k: (0, k)),
            pl.BlockSpec((ti, Do_pad), lambda i, k: (k, 0)),
            pl.BlockSpec((1, Do_pad), lambda i, k: (0, 0)),
        ],
        out_specs=pl.BlockSpec((tm, Do_pad), lambda i, k: (i, 0)),
        scratch_shapes=[pltpu.VMEM((tm, Do_pad), jnp.float32)],
        compiler_params=pltpu.CompilerParams(
            dimension_semantics=("parallel", "arbitrary"),
            vmem_limit_bytes=vmem_limit),
    )(x_p, w1_t, b1, w2_t, b2)
    return y[:T, :out_dim].reshape(B, S, out_dim)


@functools.partial(jax.jit, static_argnames=("out_dim", "tm", "ti", "vmem_limit"))
def llama_mlp_forward(x, wgu_t, wd_t, *, out_dim, tm, ti, vmem_limit):
    B, S, D = x.shape
    T = B * S
    _, D_pad, I_pad = wgu_t.shape
    Do_pad = wd_t.shape[1]
    T_pad = _round_up(T, tm)

    x_p = _pad2d(x.reshape(T, D).astype(wgu_t.dtype), (T_pad, D_pad))

    y = pl.pallas_call(
        _llama_mlp_kernel,
        out_shape=jax.ShapeDtypeStruct((T_pad, Do_pad), wgu_t.dtype),
        grid=(T_pad // tm, I_pad // ti),
        in_specs=[
            pl.BlockSpec((tm, D_pad), lambda i, k: (i, 0)),
            pl.BlockSpec((2, D_pad, ti), lambda i, k: (0, 0, k)),
            pl.BlockSpec((ti, Do_pad), lambda i, k: (k, 0)),
        ],
        out_specs=pl.BlockSpec((tm, Do_pad), lambda i, k: (i, 0)),
        scratch_shapes=[pltpu.VMEM((tm, Do_pad), jnp.float32)],
        compiler_params=pltpu.CompilerParams(
            dimension_semantics=("parallel", "arbitrary"),
            vmem_limit_bytes=vmem_limit),
    )(x_p, wgu_t, wd_t)
    return y[:T, :out_dim].reshape(B, S, out_dim)


# ----------------------------------------------------------------------------
# weight preparation: transpose to [in,out], cast once, pad to 128-lane multiples.
# Biases stay fp32 (they are added to the fp32 accumulator in-kernel).
# ----------------------------------------------------------------------------
def _prepare_gpt2(p, dtype):
    I, D = p['w1'].shape
    Do = p['w2'].shape[0]
    D_pad, I_pad, Do_pad = _round_up(D, 128), _round_up(I, 128), _round_up(Do, 128)
    return {
        'w1_t': _pad2d(jnp.transpose(p['w1']).astype(dtype), (D_pad, I_pad)),
        'b1':   _pad2d(p['b1'].astype(jnp.float32).reshape(1, -1), (1, I_pad)),
        'w2_t': _pad2d(jnp.transpose(p['w2']).astype(dtype), (I_pad, Do_pad)),
        'b2':   _pad2d(p['b2'].astype(jnp.float32).reshape(1, -1), (1, Do_pad)),
        'out_dim': Do, 'in_dim': D,
        'dims': (D_pad, I_pad, Do_pad), 'n_w1_streams': 1,
    }


def _prepare_llama(p, dtype):
    I, D = p['wg'].shape
    Do = p['wd'].shape[0]
    D_pad, I_pad, Do_pad = _round_up(D, 128), _round_up(I, 128), _round_up(Do, 128)
    wg_t = _pad2d(jnp.transpose(p['wg']).astype(dtype), (D_pad, I_pad))
    wu_t = _pad2d(jnp.transpose(p['wu']).astype(dtype), (D_pad, I_pad))
    return {
        'wgu_t': jnp.stack([wg_t, wu_t], axis=0),          # one weight DMA stream
        'wd_t':  _pad2d(jnp.transpose(p['wd']).astype(dtype), (I_pad, Do_pad)),
        'out_dim': Do, 'in_dim': D,
        'dims': (D_pad, I_pad, Do_pad), 'n_w1_streams': 2,
    }


# ----------------------------------------------------------------------------
# DynamicFFN: JAX/Pallas mirror of the PyTorch DynamicFFNModule
# ----------------------------------------------------------------------------
class DynamicFFN:
    """Pallas-backed dynamic FFN with switchable active neurons.

    Input weights use PyTorch Linear convention ([out_features, in_features]);
    transposed / cast / padded versions are prepared once and cached.
    Default compute dtype is bf16 (native MXU dtype); pass dtype=jnp.float32
    for an fp32 fallback path.
    """

    def __init__(self, params, module_type, dtype=jnp.bfloat16):
        if module_type not in ('gpt2_mlp', 'llama_mlp'):
            # TODO(synk): the PyTorch version falls back to an arbitrary
            # original_module callable for unknown types; no Pallas equivalent.
            raise ValueError(f"unsupported module_type: {module_type}")
        self.params = params
        self.module_type = module_type
        self.dtype = dtype
        self.active_indices = None
        self.reduced_prepared = None
        self.using_reduced = False
        self.cached_modules = {}
        self._prepare_fn = _prepare_gpt2 if module_type == 'gpt2_mlp' else _prepare_llama
        # Prepare (transpose + cast + pad) the original weights exactly once.
        self.orig_prepared = self._prepare_fn(params, dtype)

    def update_active_neurons(self, active_indices: Set[int]):
        sorted_indices = sorted(list(active_indices))
        key = tuple(sorted_indices)          # exact key: no hash-collision risk
        if key in self.cached_modules:
            self.reduced_prepared = self.cached_modules[key]
        else:
            self.reduced_prepared = self._create_reduced_prepared(sorted_indices)
            self.cached_modules[key] = self.reduced_prepared
        self.active_indices = active_indices
        self.using_reduced = True

    def use_original(self):
        self.using_reduced = False

    def _create_reduced_prepared(self, sorted_indices):
        # Gather active neurons, then prepare (transpose/cast/pad to a 128
        # multiple — zero rows/cols are a mathematical no-op).
        idx = jnp.asarray(sorted_indices, dtype=jnp.int32)
        p = self.params
        if self.module_type == 'gpt2_mlp':
            reduced = {'w1': p['w1'][idx, :], 'b1': p['b1'][idx],
                       'w2': p['w2'][:, idx], 'b2': p['b2']}
        else:  # llama_mlp
            reduced = {'wg': p['wg'][idx, :], 'wu': p['wu'][idx, :],
                       'wd': p['wd'][:, idx]}
        return self._prepare_fn(reduced, self.dtype)

    def _tiles_for(self, prep, T, tile_budget):
        D_pad, I_pad, Do_pad = prep['dims']
        itemsize = jnp.dtype(self.dtype).itemsize
        return _select_tiles(T, D_pad, I_pad, Do_pad, itemsize,
                             prep['n_w1_streams'], tile_budget)

    def __call__(self, x):
        prep = (self.reduced_prepared
                if (self.using_reduced and self.reduced_prepared is not None)
                else self.orig_prepared)
        B, S, _ = x.shape
        vmem_limit, tile_budget = _vmem_budgets()
        tm, ti = self._tiles_for(prep, B * S, tile_budget)
        if self.module_type == 'gpt2_mlp':
            return gpt2_mlp_forward(x, prep['w1_t'], prep['b1'],
                                    prep['w2_t'], prep['b2'],
                                    out_dim=prep['out_dim'], tm=tm, ti=ti,
                                    vmem_limit=vmem_limit)
        else:  # llama_mlp
            return llama_mlp_forward(x, prep['wgu_t'], prep['wd_t'],
                                     out_dim=prep['out_dim'], tm=tm, ti=ti,
                                     vmem_limit=vmem_limit)


# ----------------------------------------------------------------------------
# Pure-JAX references (correctness check only)
# ----------------------------------------------------------------------------
def _gelu_tanh(x):
    return 0.5 * x * (1.0 + jnp.tanh(0.7978845608028654 * (x + 0.044715 * x ** 3)))


def _gpt2_ref(x, w1, b1, w2, b2):
    h = _gelu_tanh(x @ w1.T + b1)
    return h @ w2.T + b2


def _llama_ref(x, wg, wu, wd):
    g = x @ wg.T
    u = x @ wu.T
    return (jax.nn.silu(g) * u) @ wd.T


if __name__ == "__main__":
    key = jax.random.PRNGKey(0)
    B, S, D, I = 2, 8, 32, 384          # batch, seq, hidden, intermediate

    ks = jax.random.split(key, 8)
    x = jax.random.normal(ks[0], (B, S, D), jnp.float32)

    # deterministic synthetic parameters (PyTorch Linear convention [out, in])
    gpt2_params = {
        'w1': 0.05 * jax.random.normal(ks[1], (I, D), jnp.float32),
        'b1': 0.01 * jax.random.normal(ks[2], (I,), jnp.float32),
        'w2': 0.05 * jax.random.normal(ks[3], (D, I), jnp.float32),
        'b2': 0.01 * jax.random.normal(ks[4], (D,), jnp.float32),
    }
    llama_params = {
        'wg': 0.05 * jax.random.normal(ks[5], (I, D), jnp.float32),
        'wu': 0.05 * jax.random.normal(ks[6], (I, D), jnp.float32),
        'wd': 0.05 * jax.random.normal(ks[7], (D, I), jnp.float32),
    }

    active = set(range(0, I, 2))        # keep I/2 neurons
    idx = jnp.asarray(sorted(active), dtype=jnp.int32)

    ok = True

    # ---- GPT-2 MLP path (fp32 fallback, tight tolerance) ----
    mod = DynamicFFN(gpt2_params, 'gpt2_mlp', jnp.float32)
    y_orig = jax.block_until_ready(mod(x))
    ref = _gpt2_ref(x.reshape(-1, D), **gpt2_params).reshape(B, S, D)
    ok &= bool(jnp.allclose(y_orig, ref, atol=1e-4, rtol=1e-4))

    mod.update_active_neurons(active)
    y_red = jax.block_until_ready(mod(x))
    ref_red = _gpt2_ref(x.reshape(-1, D),
                        gpt2_params['w1'][idx, :], gpt2_params['b1'][idx],
                        gpt2_params['w2'][:, idx], gpt2_params['b2']).reshape(B, S, D)
    ok &= bool(jnp.allclose(y_red, ref_red, atol=1e-4, rtol=1e-4))

    mod.use_original()
    y_back = jax.block_until_ready(mod(x))
    ok &= bool(jnp.allclose(y_back, y_orig, atol=1e-5, rtol=1e-5))

    # ---- LLaMA MLP path (fp32 fallback, tight tolerance) ----
    lmod = DynamicFFN(llama_params, 'llama_mlp', jnp.float32)
    ly_orig = jax.block_until_ready(lmod(x))
    lref = _llama_ref(x.reshape(-1, D), **llama_params).reshape(B, S, D)
    ok &= bool(jnp.allclose(ly_orig, lref, atol=1e-4, rtol=1e-4))

    lmod.update_active_neurons(active)
    ly_red = jax.block_until_ready(lmod(x))
    lref_red = _llama_ref(x.reshape(-1, D),
                          llama_params['wg'][idx, :], llama_params['wu'][idx, :],
                          llama_params['wd'][:, idx]).reshape(B, S, D)
    ok &= bool(jnp.allclose(ly_red, lref_red, atol=1e-4, rtol=1e-4))

    # ---- default (bf16) compute path, loose tolerance vs fp32 reference ----
    bmod = DynamicFFN(gpt2_params, 'gpt2_mlp')           # dtype defaults to bf16
    by = jax.block_until_ready(bmod(x)).astype(jnp.float32)
    ok &= bool(jnp.allclose(by, ref, atol=2e-2, rtol=2e-2))

    blmod = DynamicFFN(llama_params, 'llama_mlp')        # dtype defaults to bf16
    bly = jax.block_until_ready(blmod(x)).astype(jnp.float32)
    ok &= bool(jnp.allclose(bly, lref, atol=2e-2, rtol=2e-2))

    if ok:
        print("KERNEL_OK")
    else:
        print("MISMATCH")
</pallas_src>

<mosaic_0001>
module attributes {stable_mosaic.version = 11 : i64} {
  func.func @_gpt2_mlp_kernel(%arg0: i32, %arg1: i32, %arg2: memref<16x128xf32, #tpu.memory_space<vmem>>, %arg3: memref<128x384xf32, #tpu.memory_space<vmem>>, %arg4: memref<1x384xf32, #tpu.memory_space<vmem>>, %arg5: memref<384x128xf32, #tpu.memory_space<vmem>>, %arg6: memref<1x128xf32, #tpu.memory_space<vmem>>, %arg7: memref<16x128xf32, #tpu.memory_space<vmem>>, %arg8: memref<16x128xf32, #tpu.memory_space<vmem>>) attributes {dimension_semantics = [#tpu.dimension_semantics<parallel>, #tpu.dimension_semantics<arbitrary>], iteration_bounds = array<i64: 1, 1>, scalar_prefetch = 0 : i64, scratch_operands = 1 : i64, tpu.core_type = #tpu.core_type<tc>, window_params = [{transform_indices = @transform_0, window_bounds = array<i64: 16, 128>}, {transform_indices = @transform_1, window_bounds = array<i64: 128, 384>}, {transform_indices = @transform_2, window_bounds = array<i64: 1, 384>}, {transform_indices = @transform_3, window_bounds = array<i64: 384, 128>}, {pipeline_mode = #tpu.pipeline_mode<synchronous>, transform_indices = @transform_4, window_bounds = array<i64: 1, 128>}, {transform_indices = @transform_5, window_bounds = array<i64: 16, 128>}]} {
    %c0_i32 = arith.constant 0 : i32
    %0 = arith.cmpi eq, %arg1, %c0_i32 : i32
    %1 = arith.extui %0 : i1 to i32
    %c0_i32_0 = arith.constant 0 : i32
    %2 = arith.cmpi ne, %1, %c0_i32_0 : i32
    scf.if %2 {
      %cst_19 = arith.constant 0.000000e+00 : f32
      %29 = vector.broadcast %cst_19 : f32 to vector<16x128xf32>
      %c0_20 = arith.constant 0 : index
      %c0_21 = arith.constant 0 : index
      %30 = vector.load %arg8[%c0_20, %c0_21] : memref<16x128xf32, #tpu.memory_space<vmem>>, vector<16x128xf32>
      tpu.vector_store %arg8[%c0_20, %c0_21], %29 {strides = array<i32>} : memref<16x128xf32, #tpu.memory_space<vmem>>, vector<16x128xf32>,
    } else {
    }
    %c0 = arith.constant 0 : index
    %c0_1 = arith.constant 0 : index
    %3 = vector.load %arg2[%c0, %c0_1] : memref<16x128xf32, #tpu.memory_space<vmem>>, vector<16x128xf32>
    %c0_2 = arith.constant 0 : index
    %c0_3 = arith.constant 0 : index
    %4 = vector.load %arg3[%c0_2, %c0_3] : memref<128x384xf32, #tpu.memory_space<vmem>>, vector<128x384xf32>
    %cst = arith.constant dense<0.000000e+00> : vector<16x384xf32>
    %5 = tpu.matmul %3, %4, %cst {dimension_numbers = #tpu.dot_dimension_numbers<[1], [0], [0], [1], [0, 0, 1, 1], [], []>} : vector<16x128xf32>, vector<128x384xf32>, vector<16x384xf32> -> vector<16x384xf32>
    %c0_4 = arith.constant 0 : index
    %c0_5 = arith.constant 0 : index
    %6 = vector.load %arg4[%c0_4, %c0_5] : memref<1x384xf32, #tpu.memory_space<vmem>>, vector<1x384xf32>
    %7 = vector.broadcast %6 : vector<1x384xf32> to vector<16x384xf32>
    %8 = arith.addf %5, %7 : vector<16x384xf32>
    %9 = arith.mulf %8, %8 : vector<16x384xf32>
    %cst_6 = arith.constant 5.000000e-01 : f32
    %10 = vector.broadcast %cst_6 : f32 to vector<16x384xf32>
    %11 = arith.mulf %10, %8 : vector<16x384xf32>
    %cst_7 = arith.constant 0.0356774069 : f32
    %12 = vector.broadcast %cst_7 : f32 to vector<16x384xf32>
    %13 = arith.mulf %12, %9 : vector<16x384xf32>
    %cst_8 = arith.constant 0.797884583 : f32
    %14 = vector.broadcast %cst_8 : f32 to vector<16x384xf32>
    %15 = arith.addf %14, %13 : vector<16x384xf32>
    %16 = arith.mulf %8, %15 : vector<16x384xf32>
    %17 = math.tanh %16 : vector<16x384xf32>
    %cst_9 = arith.constant 1.000000e+00 : f32
    %18 = vector.broadcast %cst_9 : f32 to vector<16x384xf32>
    %19 = arith.addf %18, %17 : vector<16x384xf32>
    %20 = arith.mulf %11, %19 : vector<16x384xf32>
    %c0_10 = arith.constant 0 : index
    %c0_11 = arith.constant 0 : index
    %21 = vector.load %arg8[%c0_10, %c0_11] : memref<16x128xf32, #tpu.memory_space<vmem>>, vector<16x128xf32>
    %c0_12 = arith.constant 0 : index
    %c0_13 = arith.constant 0 : index
    %22 = vector.load %arg5[%c0_12, %c0_13] : memref<384x128xf32, #tpu.memory_space<vmem>>, vector<384x128xf32>
    %cst_14 = arith.constant dense<0.000000e+00> : vector<16x128xf32>
    %23 = tpu.matmul %20, %22, %cst_14 {dimension_numbers = #tpu.dot_dimension_numbers<[1], [0], [0], [1], [0, 0, 1, 1], [], []>} : vector<16x384xf32>, vector<384x128xf32>, vector<16x128xf32> -> vector<16x128xf32>
    %24 = arith.addf %21, %23 : vector<16x128xf32>
    %c0_15 = arith.constant 0 : index
    %c0_16 = arith.constant 0 : index
    %25 = vector.load %arg8[%c0_15, %c0_16] : memref<16x128xf32, #tpu.memory_space<vmem>>, vector<16x128xf32>
    tpu.vector_store %arg8[%c0_15, %c0_16], %24 {strides = array<i32>} : memref<16x128xf32, #tpu.memory_space<vmem>>, vector<16x128xf32>,
    %c0_i32_17 = arith.constant 0 : i32
    %26 = arith.cmpi eq, %arg1, %c0_i32_17 : i32
    %27 = arith.extui %26 : i1 to i32
    %c0_i32_18 = arith.constant 0 : i32
    %28 = arith.cmpi ne, %27, %c0_i32_18 : i32
    scf.if %28 {
      %c0_19 = arith.constant 0 : index
      %c0_20 = arith.constant 0 : index
      %29 = vector.load %arg8[%c0_19, %c0_20] : memref<16x128xf32, #tpu.memory_space<vmem>>, vector<16x128xf32>
      %c0_21 = arith.constant 0 : index
      %c0_22 = arith.constant 0 : index
      %30 = vector.load %arg6[%c0_21, %c0_22] : memref<1x128xf32, #tpu.memory_space<vmem>>, vector<1x128xf32>
      %31 = vector.broadcast %30 : vector<1x128xf32> to vector<16x128xf32>
      %32 = arith.addf %29, %31 : vector<16x128xf32>
      %c0_23 = arith.constant 0 : index
      %c0_24 = arith.constant 0 : index
      %33 = vector.load %arg7[%c0_23, %c0_24] : memref<16x128xf32, #tpu.memory_space<vmem>>, vector<16x128xf32>
      tpu.vector_store %arg7[%c0_23, %c0_24], %32 {strides = array<i32>} : memref<16x128xf32, #tpu.memory_space<vmem>>, vector<16x128xf32>,
    } else {
    }
    return
  }
  func.func @transform_0(%arg0: i32, %arg1: i32) -> (i32, i32) {
    %c0_i32 = arith.constant 0 : i32
    %c0_i32_0 = arith.constant 0 : i32
    return %arg0, %c0_i32 : i32, i32
  }
  func.func @transform_1(%arg0: i32, %arg1: i32) -> (i32, i32) {
    %c0_i32 = arith.constant 0 : i32
    %c0_i32_0 = arith.constant 0 : i32
    return %c0_i32, %arg1 : i32, i32
  }
  func.func @transform_2(%arg0: i32, %arg1: i32) -> (i32, i32) {
    %c0_i32 = arith.constant 0 : i32
    %c0_i32_0 = arith.constant 0 : i32
    return %c0_i32, %arg1 : i32, i32
  }
  func.func @transform_3(%arg0: i32, %arg1: i32) -> (i32, i32) {
    %c0_i32 = arith.constant 0 : i32
    %c0_i32_0 = arith.constant 0 : i32
    return %arg1, %c0_i32 : i32, i32
  }
  func.func @transform_4(%arg0: i32, %arg1: i32) -> (i32, i32) {
    %c0_i32 = arith.constant 0 : i32
    %c0_i32_0 = arith.constant 0 : i32
    %c0_i32_1 = arith.constant 0 : i32
    return %c0_i32, %c0_i32_0 : i32, i32
  }
  func.func @transform_5(%arg0: i32, %arg1: i32) -> (i32, i32) {
    %c0_i32 = arith.constant 0 : i32
    %c0_i32_0 = arith.constant 0 : i32
    return %arg0, %c0_i32 : i32, i32
  }
}

</mosaic_0001>

<bundles_post_ra>
// kernel: gpt2_mlp_forward.1
= control target key start
LH: loop header
LB: loop body
LE: loop exit
PB: predicated region body
PF: predicated region fallthrough
CT: control target
= control target key end

     0   :  { %10 = vsyncpa [#allocation4], 0  ;;  %s968_s0 = inlined_call_operand.vmem [shape: f32[16,128], index: 0, kind: input, shape index: {}]   ;;  %s969_s1 = inlined_call_operand.hbm [shape: f32[128,384], index: 1, kind: input, shape index: {}]   ;;  %s970_s2 = inlined_call_operand.vmem [shape: f32[1,384], index: 2, kind: input, shape index: {}]   ;;  %s971_s3 = inlined_call_operand.hbm [shape: f32[384,128], index: 3, kind: input, shape index: {}]   ;;  %s972_s4 = inlined_call_operand.vmem [shape: f32[1,128], index: 4, kind: input, shape index: {}]   ;;  %s973_s5 = inlined_call_operand.vmem [shape: f32[16,128], index: 5, kind: output, shape index: {}]  }
   0x1   :  { %11 = vsyncpa [#allocation6], 0  ;;  %s887_s18 = smov [#allocation3]   ;;  %s839_s22 = scalar_lea.hbm %s969_s1, 6144 }
   0x2   :  { %s19_s19 = sshll.u32 %s887_s18, 4  ;;  %p840_p0 = scmp.ne.s32.totalorder %s969_s1, %s839_s22  ;;  %s20_s19 = int_to_ptr.vmem [resolvable:$true] %s19_s19 }
   0x3   :  { %p843_p1 = scmp.lt.u32.totalorder %s839_s22, %s969_s1 }
   0x5   :  { %p845_p2 = pnand %p843_p1, %p840_p0 }
   0x7   :  { %848 = shalt.err (!%p845_p2)
}
   0x8   :  { %s849_s27 = scalar_lea.vmem %s20_s19, 6144  ;;  %p854_p4 = scmp.lt.s32.totalorder %s20_s19, %s20_s19 }
   0x9   :  { %p850_p3 = scmp.ne.s32.totalorder %s20_s19, %s849_s27  ;;  %p855_p5 = scmp.lt.s32.totalorder %s849_s27, %s849_s27 }
   0xb   :  { %p856_p6 = por %p855_p5, %p854_p4 }
   0xd   :  { %p857_p7 = pnand %p856_p6, %p850_p3 }
   0xf   :  { %860 = shalt.err (!%p857_p7)
}
  0x10   :  { %s888_s28 = smov 384   ;;  %s889_s29 = smov 24  }
  0x11   :  { %25 = dma.hbm_to_vmem [thread:$0]  %s969_s1, 6144, %s20_s19, [#allocation4], %s888_s28, %s888_s28, %s889_s29  }
  0x12   :  { %s890_s7 = smov [#allocation5]   ;;  %s861_s11 = scalar_lea.hbm %s971_s3, 6144 }
  0x13   :  { %s33_s8 = sshll.u32 %s890_s7, 4  ;;  %p862_p8 = scmp.ne.s32.totalorder %s971_s3, %s861_s11  ;;  %s34_s8 = int_to_ptr.vmem [resolvable:$true] %s33_s8 }
  0x14   :  { %p865_p9 = scmp.lt.u32.totalorder %s861_s11, %s971_s3 }
  0x16   :  { %p867_p10 = pnand %p865_p9, %p862_p8 }
  0x18   :  { %870 = shalt.err (!%p867_p10)
}
  0x19   :  { %s871_s16 = scalar_lea.vmem %s34_s8, 6144  ;;  %p876_p12 = scmp.lt.s32.totalorder %s34_s8, %s34_s8 }
  0x1a   :  { %p872_p11 = scmp.ne.s32.totalorder %s34_s8, %s871_s16  ;;  %p877_p13 = scmp.lt.s32.totalorder %s871_s16, %s871_s16 }
  0x1c   :  { %p878_p0 = por %p877_p13, %p876_p12 }
  0x1e   :  { %p879_p1 = pnand %p878_p0, %p872_p11 }
  0x20   :  { %882 = shalt.err (!%p879_p1)
}
  0x21   :  { %s891_s1 = smov 128   ;;  %s892_s17 = smov 8  }
  0x22   :  { %39 = dma.hbm_to_vmem [thread:$0]  %s971_s3, 6144, %s34_s8, [#allocation6], %s891_s1, %s891_s1, %s892_s17  }
  0x23   :  { %883 = dma.done.wait [#allocation4], 6144  }
  0x24   :  { %884 = vsyncadd [#allocation4], 4294961152 }
  0x25   :  { %885 = dma.done.wait [#allocation6], 6144  }
  0x26   :  { %886 = vsyncadd [#allocation6], 4294961152  ;;  %v893_v0 = vmov 0.0   ;;  %v57_v1 = vld [vmem:[#allocation3 + $0x8] sm:$0xff]  ;;  %v60_v2 = vld [vmem:[#allocation3 + $0x20] sm:$0xff] }
  0x27   :  { %185 = vmatprep.mubr.f32.mxu0 %v893_v0  ;;  %v58_v3 = vld [vmem:[#allocation3 + $0x10] sm:$0xff]  ;;  %v692_v4 = vpack.c.bf16 %v60_v2, %v57_v1  ;;  %v61_v5 = vld [vmem:[#allocation3 + $0x28] sm:$0xff]  ;;  %v56_v6 = vld [vmem:[#allocation3] sm:$0xff] }
  0x28   :  { %v59_v7 = vld [vmem:[#allocation3 + $0x18] sm:$0xff]  ;;  %v724_v8 = vpack.c.bf16 %v61_v5, %v58_v3  ;;  %v66_v11 = vld [vmem:[#allocation3 + $0x50] sm:$0xff]  ;;  %v64_v12 = vld [vmem:[#allocation3 + $0x40] sm:$0xff] }
  0x29   :  { %v694_v9 = vpack.c.bf16 %v59_v7, %v56_v6  ;;  %v63_v10 = vld [vmem:[#allocation3 + $0x38] sm:$0xff]  ;;  %693 = vmatprep.subr.bf16.mxu0 %v692_v4  ;;  %v62_v15 = vld [vmem:[#allocation3 + $0x30] sm:$0xff]  ;;  %v65_v16 = vld [vmem:[#allocation3 + $0x48] sm:$0xff] }
  0x2a   :  { %v696_v13 = vpack.c.bf16 %v66_v11, %v63_v10  ;;  %v67_v14 = vld [vmem:[#allocation3 + $0x58] sm:$0xff]  ;;  %725 = vmatprep.subr.bf16.mxu1 %v724_v8  ;;  %v698_v18 = vpack.c.bf16 %v65_v16, %v62_v15  ;;  %v69_v19 = vld [vmem:[#allocation3 + $0x68] sm:$0xff]  ;;  %v72_v20 = vld [vmem:[#allocation3 + $0x80] sm:$0xff] }
  0x2b   :  { %695 = vmatpush1.bf16.msra.mxu0 %v694_v9  ;;  %v728_v17 = vpack.c.bf16 %v67_v14, %v64_v12  ;;  %v70_v21 = vld [vmem:[#allocation3 + $0x70] sm:$0xff]  ;;  %727 = vmatpush3.bf16.msra.mxu1 %v724_v8  ;;  %v700_v22 = vpack.c.bf16 %v72_v20, %v69_v19  ;;  %v73_v23 = vld [vmem:[#allocation3 + $0x88] sm:$0xff]  ;;  %v68_v24 = vld [vmem:[#allocation3 + $0x60] sm:$0xff] }
  0x2c   :  { %697 = vmatprep.subr.bf16.mxu0 %v696_v13  ;;  %v71_v25 = vld [vmem:[#allocation3 + $0x78] sm:$0xff]  ;;  %v732_v26 = vpack.c.bf16 %v73_v23, %v70_v21  ;;  %v78_v28 = vld [vmem:[#allocation3 + $0xb0] sm:$0xff]  ;;  %v76_v29 = vld [vmem:[#allocation3 + $0xa0] sm:$0xff] }
  0x2d   :  { %729 = vmatprep.subr.bf16.mxu1 %v728_v17  ;;  %v75_v27 = vld [vmem:[#allocation3 + $0x98] sm:$0xff]  ;;  %v702_v31 = vpack.c.bf16 %v71_v25, %v68_v24  ;;  %v74_v33 = vld [vmem:[#allocation3 + $0x90] sm:$0xff]  ;;  %v77_v34 = vld [vmem:[#allocation3 + $0xa8] sm:$0xff] }
  0x2e   :  { %v79_v30 = vld [vmem:[#allocation3 + $0xb8] sm:$0xff]  ;;  %v704_v32 = vpack.c.bf16 %v78_v28, %v75_v27  ;;  %v81_v36 = vld [vmem:[#allocation3 + $0xc8] sm:$0xff]  ;;  %v84_v37 = vld [vmem:[#allocation3 + $0xe0] sm:$0xff]  ;;  %v706_v40 = vpack.c.bf16 %v77_v34, %v74_v33 }
  0x2f   :  { %699 = vmatpush1.bf16.msra.mxu0 %v698_v18  ;;  %731 = vmatpush3.bf16.msra.mxu1 %v728_v17  ;;  %v736_v35 = vpack.c.bf16 %v79_v30, %v76_v29  ;;  %v82_v38 = vld [vmem:[#allocation3 + $0xd0] sm:$0xff]  ;;  %v85_v39 = vld [vmem:[#allocation3 + $0xe8] sm:$0xff]  ;;  %v708_v41 = vpack.c.bf16 %v84_v37, %v81_v36  ;;  %v80_v42 = vld [vmem:[#allocation3 + $0xc0] sm:$0xff] }
  0x30   :  { %701 = vmatprep.subr.bf16.mxu0 %v700_v22  ;;  %733 = vmatprep.subr.bf16.mxu1 %v732_v26  ;;  %v83_v43 = vld [vmem:[#allocation3 + $0xd8] sm:$0xff]  ;;  %v740_v44 = vpack.c.bf16 %v85_v39, %v82_v38  ;;  %v90_v46 = vld [vmem:[#allocation3 + $0x110] sm:$0xff]  ;;  %v88_v47 = vld [vmem:[#allocation3 + $0x100] sm:$0xff] }
  0x31   :  { %v87_v45 = vld [vmem:[#allocation3 + $0xf8] sm:$0xff]  ;;  %v710_v49 = vpack.c.bf16 %v83_v43, %v80_v42  ;;  %v54_v50 = vld [vmem:[%s968_s0] sm:$0xff]  ;;  %v86_v52 = vld [vmem:[#allocation3 + $0xf0] sm:$0xff] }
  0x32   :  { %v91_v48 = vld [vmem:[#allocation3 + $0x118] sm:$0xff]  ;;  %v712_v51 = vpack.c.bf16 %v90_v46, %v87_v45  ;;  %v89_v53 = vld [vmem:[#allocation3 + $0x108] sm:$0xff]  ;;  %v96_v56 = vld [vmem:[#allocation3 + $0x140] sm:$0xff]  ;;  %654 = vmatprep.mubr.f32.mxu1 %v54_v50 }
  0x33   :  { %703 = vmatpush1.bf16.msra.mxu0 %v702_v31  ;;  %735 = vmatpush3.bf16.msra.mxu1 %v732_v26  ;;  %v744_v54 = vpack.c.bf16 %v91_v48, %v88_v47  ;;  %v93_v55 = vld [vmem:[#allocation3 + $0x128] sm:$0xff]  ;;  %v94_v57 = vld [vmem:[#allocation3 + $0x130] sm:$0xff]  ;;  %v714_v59 = vpack.c.bf16 %v89_v53, %v86_v52  ;;  %v92_v61 = vld [vmem:[#allocation3 + $0x120] sm:$0xff] }
  0x34   :  { %705 = vmatprep.subr.bf16.mxu0 %v704_v32  ;;  %737 = vmatprep.subr.bf16.mxu1 %v736_v35  ;;  %v97_v58 = vld [vmem:[#allocation3 + $0x148] sm:$0xff]  ;;  %v716_v60 = vpack.c.bf16 %v96_v56, %v93_v55  ;;  %v95_v62 = vld [vmem:[#allocation3 + $0x138] sm:$0xff]  ;;  %v102_v2 = vld [vmem:[#allocation3 + $0x170] sm:$0xff] }
  0x35   :  { %v748_v63 = vpack.c.bf16 %v97_v58, %v94_v57  ;;  %v99_v1 = vld [vmem:[#allocation3 + $0x158] sm:$0xff]  ;;  %v100_v3 = vld [vmem:[#allocation3 + $0x160] sm:$0xff]  ;;  %v718_v5 = vpack.c.bf16 %v95_v62, %v92_v61  ;;  %v98_v7 = vld [vmem:[#allocation3 + $0x150] sm:$0xff] }
  0x36   :  { %v103_v4 = vld [vmem:[#allocation3 + $0x178] sm:$0xff]  ;;  %v720_v6 = vpack.c.bf16 %v102_v2, %v99_v1  ;;  %v101_v8 = vld [vmem:[#allocation3 + $0x168] sm:$0xff]  ;;  %v339_v10 = vld [vmem:[#allocation5 + $0x80] sm:$0xff] }
  0x37   :  { %707 = vmatpush1.bf16.msra.mxu0 %v706_v40  ;;  %739 = vmatpush3.bf16.msra.mxu1 %v736_v35  ;;  %v752_v9 = vpack.c.bf16 %v103_v4, %v100_v3  ;;  %v340_v11 = vld [vmem:[#allocation5 + $0x88] sm:$0xff]  ;;  %v355_v12 = vld [vmem:[#allocation5 + $0x100] sm:$0xff]  ;;  %v722_v14 = vpack.c.bf16 %v101_v8, %v98_v7  ;;  %v341_v21 = vld [vmem:[#allocation5 + $0x90] sm:$0xff] }
  0x38   :  { %709 = vmatprep.subr.bf16.mxu0 %v708_v41  ;;  %741 = vmatprep.subr.bf16.mxu1 %v740_v44  ;;  %v356_v13 = vld [vmem:[#allocation5 + $0x108] sm:$0xff]  ;;  %v756_v15 = vpack.c.bf16 %v340_v11, %v339_v10  ;;  %v323_v17 = vld [vmem:[#allocation5] sm:$0xff]  ;;  %v342_v22 = vld [vmem:[#allocation5 + $0x98] sm:$0xff] }
  0x39   :  { %v788_v16 = vpack.c.bf16 %v356_v13, %v355_v12  ;;  %v324_v18 = vld [vmem:[#allocation5 + $0x8] sm:$0xff]  ;;  %v357_v23 = vld [vmem:[#allocation5 + $0x110] sm:$0xff]  ;;  %v760_v24 = vpack.c.bf16 %v342_v22, %v341_v21  ;;  %v358_v25 = vld [vmem:[#allocation5 + $0x118] sm:$0xff] }
  0x3a   :  { %v55_v19 = vld [vmem:[%s968_s0 + $0x8] sm:$0xff]  ;;  %v758_v20 = vpack.c.bf16 %v324_v18, %v323_v17  ;;  %v792_v26 = vpack.c.bf16 %v358_v25, %v357_v23  ;;  %v325_v27 = vld [vmem:[#allocation5 + $0x10] sm:$0xff]  ;;  %v326_v28 = vld [vmem:[#allocation5 + $0x18] sm:$0xff] }
  0x3b   :  { %711 = vmatpush1.bf16.msra.mxu0 %v710_v49  ;;  %743 = vmatpush3.bf16.msra.mxu1 %v740_v44  ;;  %v762_v29 = vpack.c.bf16 %v326_v28, %v325_v27  ;;  %v343_v30 = vld [vmem:[#allocation5 + $0xa0] sm:$0xff]  ;;  %v344_v31 = vld [vmem:[#allocation5 + $0xa8] sm:$0xff]  ;;  %v345_v38 = vld [vmem:[#allocation5 + $0xb0] sm:$0xff] }
  0x3c   :  { %713 = vmatprep.subr.bf16.mxu0 %v712_v51  ;;  %745 = vmatprep.subr.bf16.mxu1 %v744_v54  ;;  %v359_v32 = vld [vmem:[#allocation5 + $0x120] sm:$0xff]  ;;  %v360_v33 = vld [vmem:[#allocation5 + $0x128] sm:$0xff]  ;;  %v346_v39 = vld [vmem:[#allocation5 + $0xb8] sm:$0xff] }
  0x3d   :  { %v327_v34 = vld [vmem:[#allocation5 + $0x20] sm:$0xff]  ;;  %v328_v35 = vld [vmem:[#allocation5 + $0x28] sm:$0xff]  ;;  %v796_v36 = vpack.c.bf16 %v360_v33, %v359_v32  ;;  %v361_v40 = vld [vmem:[#allocation5 + $0x130] sm:$0xff]  ;;  %v768_v41 = vpack.c.bf16 %v346_v39, %v345_v38 }
  0x3e   :  { %v766_v37 = vpack.c.bf16 %v328_v35, %v327_v34  ;;  %v362_v42 = vld [vmem:[#allocation5 + $0x138] sm:$0xff]  ;;  %v329_v43 = vld [vmem:[#allocation5 + $0x30] sm:$0xff]  ;;  %v347_v47 = vld [vmem:[#allocation5 + $0xc0] sm:$0xff] }
  0x3f   :  { %715 = vmatpush1.bf16.msra.mxu0 %v714_v59  ;;  %747 = vmatpush3.bf16.msra.mxu1 %v744_v54  ;;  %v330_v44 = vld [vmem:[#allocation5 + $0x38] sm:$0xff]  ;;  %v800_v45 = vpack.c.bf16 %v362_v42, %v361_v40  ;;  %v348_v48 = vld [vmem:[#allocation5 + $0xc8] sm:$0xff]  ;;  %v363_v49 = vld [vmem:[#allocation5 + $0x140] sm:$0xff] }
  0x40   :  { %717 = vmatprep.subr.bf16.mxu0 %v716_v60  ;;  %749 = vmatprep.subr.bf16.mxu1 %v748_v63  ;;  %v770_v46 = vpack.c.bf16 %v330_v44, %v329_v43  ;;  %v364_v51 = vld [vmem:[#allocation5 + $0x148] sm:$0xff]  ;;  %v331_v52 = vld [vmem:[#allocation5 + $0x40] sm:$0xff]  ;;  %v349_v56 = vld [vmem:[#allocation5 + $0xd0] sm:$0xff] }
  0x41   :  { %v332_v53 = vld [vmem:[#allocation5 + $0x48] sm:$0xff]  ;;  %v804_v54 = vpack.c.bf16 %v364_v51, %v363_v49  ;;  %v350_v57 = vld [vmem:[#allocation5 + $0xd8] sm:$0xff]  ;;  %v365_v58 = vld [vmem:[#allocation5 + $0x150] sm:$0xff] }
  0x42   :  { %v774_v55 = vpack.c.bf16 %v332_v53, %v331_v52  ;;  %v776_v59 = vpack.c.bf16 %v350_v57, %v349_v56  ;;  %v366_v60 = vld [vmem:[#allocation5 + $0x158] sm:$0xff]  ;;  %v333_v61 = vld [vmem:[#allocation5 + $0x50] sm:$0xff]  ;;  %v351_v2 = vld [vmem:[#allocation5 + $0xe0] sm:$0xff] }
  0x43   :  { %719 = vmatpush1.bf16.msra.mxu0 %v718_v5  ;;  %751 = vmatpush3.bf16.msra.mxu1 %v748_v63  ;;  %v334_v62 = vld [vmem:[#allocation5 + $0x58] sm:$0xff]  ;;  %v808_v63 = vpack.c.bf16 %v366_v60, %v365_v58  ;;  %v352_v3 = vld [vmem:[#allocation5 + $0xe8] sm:$0xff]  ;;  %v367_v4 = vld [vmem:[#allocation5 + $0x160] sm:$0xff] }
  0x44   :  { %721 = vmatprep.subr.bf16.mxu0 %v720_v6  ;;  %753 = vmatprep.subr.bf16.mxu1 %v752_v9  ;;  %v778_v1 = vpack.c.bf16 %v334_v62, %v333_v61  ;;  %v780_v5 = vpack.c.bf16 %v352_v3, %v351_v2  ;;  %v368_v6 = vld [vmem:[#allocation5 + $0x168] sm:$0xff]  ;;  %v335_v7 = vld [vmem:[#allocation5 + $0x60] sm:$0xff]  ;;  %v353_v11 = vld [vmem:[#allocation5 + $0xf0] sm:$0xff] }
  0x45   :  { %v336_v8 = vld [vmem:[#allocation5 + $0x68] sm:$0xff]  ;;  %v354_v12 = vld [vmem:[#allocation5 + $0xf8] sm:$0xff]  ;;  %v369_v13 = vld [vmem:[#allocation5 + $0x170] sm:$0xff] }
  0x46   :  { %v782_v10 = vpack.c.bf16 %v336_v8, %v335_v7  ;;  %v338_v17 = vld [vmem:[#allocation5 + $0x78] sm:$0xff]  ;;  %v104_v23 = vld [vmem:[%s970_s2] sm:$0x7] }
  0x47   :  { %723 = vmatpush1.bf16.msra.mxu0 %v722_v14  ;;  %755 = vmatpush3.bf16.msra.mxu1 %v752_v9  ;;  %v812_v9 = vpack.c.bf16 %v368_v6, %v367_v4  ;;  %v784_v14 = vpack.c.bf16 %v354_v12, %v353_v11 }
  0x48   :  { %757 = vmatprep.subr.bf16.mxu0 %v756_v15  ;;  %789 = vmatprep.subr.bf16.mxu1 %v788_v16  ;;  %v370_v15 = vld [vmem:[#allocation5 + $0x178] sm:$0xff] }
  0x49   :  { %v816_v18 = vpack.c.bf16 %v370_v15, %v369_v13 }
  0x4a   :  { %186 = vmatmul.mubr.f32.vlgmr.msra.gmra.mrb[0].mxu0 %v54_v50  ;;  %655 = vmatmul.mubr.f32.vlgmr.msra.gmra.mrb[0].mxu1 %v55_v19  ;;  %v772_v50 = vpack.c.bf16 %v348_v48, %v347_v47 }
  0x4b   :  { %191 = vmatprep.mubr.f32.mxu0 %v893_v0  ;;  %759 = vmatpush3.bf16.msra.mxu0 %v758_v20  ;;  %v764_v0 = vpack.c.bf16 %v344_v31, %v343_v30  ;;  %v106_v20 = vlaneseq }
  0x4c   :  { %791 = vmatpush3.bf16.msra.mxu1 %v788_v16  ;;  %761 = vmatprep.subr.bf16.mxu0 %v760_v24  ;;  %v337_v16 = vld [vmem:[#allocation5 + $0x70] sm:$0xff] }
  0x4d   :  { %793 = vmatprep.subr.bf16.mxu1 %v792_v26  ;;  %v107_v21 = vshrl.u32 %v106_v20, 7 }
  0x4e   :  { %192 = vmatmul.mubr.f32.gmra.mrb[2].mxu0 %v55_v19  ;;  %v786_v19 = vpack.c.bf16 %v338_v17, %v337_v16 }
  0x4f   :  { %763 = vmatpush3.bf16.msra.mxu0 %v762_v29  ;;  %v108_v22 = vsub.s32 0, %v107_v21  ;;  %v116_v24 = vsub.s32 2, %v107_v21  ;;  %v112_v25 = vsub.s32 1, %v107_v21 }
  0x50   :  { %795 = vmatpush3.bf16.msra.mxu1 %v792_v26  ;;  %765 = vmatprep.subr.bf16.mxu0 %v764_v0 }
  0x51   :  { %797 = vmatprep.subr.bf16.mxu1 %v796_v36  ;;  %v109_v26 = vrot.slane %v104_v23, %v108_v22  ;;  %v117_v27 = vrot.slane %v104_v23, %v116_v24  ;;  %v113_v28 = vrot.slane %v104_v23, %v112_v25 }
  0x53   :  { %767 = vmatpush3.bf16.msra.mxu0 %v766_v37 }
  0x54   :  { %799 = vmatpush3.bf16.msra.mxu1 %v796_v36  ;;  %769 = vmatprep.subr.bf16.mxu0 %v768_v41 }
  0x55   :  { %801 = vmatprep.subr.bf16.mxu1 %v800_v45 }
  0x57   :  { %771 = vmatpush3.bf16.msra.mxu0 %v770_v46 }
  0x58   :  { %803 = vmatpush3.bf16.msra.mxu1 %v800_v45  ;;  %773 = vmatprep.subr.bf16.mxu0 %v772_v50 }
  0x59   :  { %805 = vmatprep.subr.bf16.mxu1 %v804_v54 }
  0x5b   :  { %775 = vmatpush3.bf16.msra.mxu0 %v774_v55 }
  0x5c   :  { %807 = vmatpush3.bf16.msra.mxu1 %v804_v54  ;;  %777 = vmatprep.subr.bf16.mxu0 %v776_v59 }
  0x5d   :  { %809 = vmatprep.subr.bf16.mxu1 %v808_v63 }
  0x5f   :  { %779 = vmatpush3.bf16.msra.mxu0 %v778_v1 }
  0x60   :  { %811 = vmatpush3.bf16.msra.mxu1 %v808_v63  ;;  %781 = vmatprep.subr.bf16.mxu0 %v780_v5 }
  0x61   :  { %813 = vmatprep.subr.bf16.mxu1 %v812_v9 }
  0x63   :  { %783 = vmatpush3.bf16.msra.mxu0 %v782_v10 }
  0x64   :  { %815 = vmatpush3.bf16.msra.mxu1 %v812_v9  ;;  %785 = vmatprep.subr.bf16.mxu0 %v784_v14 }
  0x65   :  { %817 = vmatprep.subr.bf16.mxu1 %v816_v18 }
  0x67   :  { %787 = vmatpush3.bf16.msra.mxu0 %v786_v19 }
  0x68   :  { %819 = vmatpush3.bf16.msra.mxu1 %v816_v18 }
 0x11d   :  { %v187_v29 = vpop.f32.mrb[0].mxu0  ;;  %v656_v31 = vpop.f32.mrb[0].mxu1 }
 0x11e   :  { %v188_v30 = vadd.f32 %v187_v29, %v109_v26  ;;  %v189_v32 = vpop.f32.mrb[1].mxu0  ;;  %v270_v0 = vadd.f32 %v656_v31, %v117_v27  ;;  %v264_v34 = vpop.f32.mrb[1].mxu1 }
 0x11f   :  { %v190_v33 = vadd.f32 %v189_v32, %v113_v28  ;;  %v265_v36 = vadd.f32 %v264_v34, %v117_v27 }
 0x120   :  { %v273_v35 = vmul.f32 %v188_v30, %v188_v30  ;;  %v278_v37 = vmul.f32 %v270_v0, %v270_v0  ;;  %v279_v10 = vmul.f32 0.5, %v188_v30  ;;  %v284_v14 = vmul.f32 0.5, %v270_v0 }
 0x121   :  { %v274_v38 = vmul.f32 %v190_v33, %v190_v33  ;;  %v193_v39 = vpop.f32.mrb[2].mxu0  ;;  %v275_v41 = vmul.f32 %v265_v36, %v265_v36  ;;  %v280_v7 = vmul.f32 0.5, %v190_v33  ;;  %v281_v11 = vmul.f32 0.5, %v265_v36 }
 0x122   :  { %v285_v40 = vmul.f32 0.035677407, %v273_v35  ;;  %v194_v42 = vadd.f32 %v193_v39, %v109_v26  ;;  %v195_v43 = vpop.f32.mrb[3].mxu0  ;;  %v290_v44 = vmul.f32 0.035677407, %v278_v37 }
 0x123   :  { %v286_v45 = vmul.f32 0.035677407, %v274_v38  ;;  %v196_v46 = vadd.f32 %v195_v43, %v113_v28  ;;  %v287_v48 = vmul.f32 0.035677407, %v275_v41 }
 0x124   :  { %v291_v47 = vadd.f32 0.7978846, %v285_v40  ;;  %v276_v49 = vmul.f32 %v194_v42, %v194_v42  ;;  %v296_v50 = vadd.f32 0.7978846, %v290_v44  ;;  %v282_v22 = vmul.f32 0.5, %v194_v42 }
 0x125   :  { %v292_v51 = vadd.f32 0.7978846, %v286_v45  ;;  %v277_v52 = vmul.f32 %v196_v46, %v196_v46  ;;  %v293_v54 = vadd.f32 0.7978846, %v287_v48  ;;  %v283_v15 = vmul.f32 0.5, %v196_v46 }
 0x126   :  { %v297_v53 = vmul.f32 %v291_v47, %v188_v30  ;;  %v288_v55 = vmul.f32 0.035677407, %v276_v49  ;;  %v302_v56 = vmul.f32 %v296_v50, %v270_v0  ;;  %v547_v30 = vld [vmem:[%s972_s4] ss:$0 sm:$0xff] }
 0x127   :  { %v298_v57 = vmul.f32 %v292_v51, %v190_v33  ;;  %v289_v58 = vmul.f32 0.035677407, %v277_v52  ;;  %v299_v59 = vmul.f32 %v293_v54, %v265_v36 }
 0x128   :  { %827 = vtanh.f32 %v297_v53  ;;  %v294_v60 = vadd.f32 0.7978846, %v288_v55 }
 0x129   :  { %829 = vtanh.f32 %v302_v56  ;;  %v295_v61 = vadd.f32 0.7978846, %v289_v58 }
 0x12a   :  { %831 = vtanh.f32 %v298_v57  ;;  %v300_v62 = vmul.f32 %v294_v60, %v194_v42 }
 0x12b   :  { %833 = vtanh.f32 %v299_v59  ;;  %v301_v63 = vmul.f32 %v295_v61, %v196_v46 }
 0x12c   :  { %835 = vtanh.f32 %v300_v62 }
 0x12d   :  { %837 = vtanh.f32 %v301_v63 }
 0x132   :  { %v828_v1 = vpop.eup %827 }
 0x133   :  { %v830_v2 = vpop.eup %829  ;;  %v309_v4 = vadd.f32 1.0, %v828_v1 }
 0x134   :  { %v832_v3 = vpop.eup %831  ;;  %v314_v6 = vadd.f32 1.0, %v830_v2 }
 0x135   :  { %v834_v5 = vpop.eup %833  ;;  %v310_v8 = vadd.f32 1.0, %v832_v3  ;;  %v315_v17 = vmul.f32 %v309_v4, %v279_v10 }
 0x136   :  { %v836_v9 = vpop.eup %835  ;;  %v311_v12 = vadd.f32 1.0, %v834_v5  ;;  %v320_v21 = vmul.f32 %v314_v6, %v284_v14 }
 0x137   :  { %v838_v13 = vpop.eup %837  ;;  %v316_v16 = vmul.f32 %v310_v8, %v280_v7  ;;  %v312_v20 = vadd.f32 1.0, %v836_v9 }
 0x138   :  { %v317_v18 = vmul.f32 %v311_v12, %v281_v11  ;;  %v313_v19 = vadd.f32 1.0, %v838_v13 }
 0x139   :  { %435 = vmatprep.mubr.f32.mxu0 %v316_v16  ;;  %v318_v24 = vmul.f32 %v312_v20, %v282_v22 }
 0x13a   :  { %689 = vmatprep.mubr.f32.mxu1 %v317_v18  ;;  %436 = vmatmul.mubr.f32.vlgmr.msra.gmra.mrb[4].mxu0 %v315_v17  ;;  %v319_v23 = vmul.f32 %v313_v19, %v283_v15 }
 0x13b   :  { %690 = vmatmul.mubr.f32.vlgmr.msra.gmra.mrb[2].mxu1 %v320_v21 }
 0x13c   :  { %440 = vmatprep.mubr.f32.mxu0 %v319_v23 }
 0x13e   :  { %441 = vmatmul.mubr.f32.gmra.mrb[6].mxu0 %v318_v24 }
 0x20d   :  { %v598_v25 = vpop.f32.mrb[4].mxu0 }
 0x20e   :  { %v691_v26 = vpop.f32.mrb[2].mxu1  ;;  %v599_v27 = vpop.f32.mrb[5].mxu0 }
 0x20f   :  { %v600_v28 = vadd.f32 %v599_v27, %v598_v25  ;;  %v512_v29 = vpop.f32.mrb[3].mxu1 }
 0x211   :  { %v513_v31 = vadd.f32 %v600_v28, %v512_v29  ;;  %v601_v32 = vpop.f32.mrb[6].mxu0 }
 0x212   :  { %v602_v0 = vpop.f32.mrb[7].mxu0 }
 0x213   :  { %v537_v33 = vadd.f32 %v547_v30, %v513_v31  ;;  %v603_v34 = vadd.f32 %v602_v0, %v601_v32 }
 0x215   :  { %539 = vst [vmem:[%s973_s5] sm:$0xff] %v537_v33  ;;  %v518_v35 = vadd.f32 %v691_v26, %v603_v34 }
 0x217   :  { %v538_v36 = vadd.f32 %v547_v30, %v518_v35 }
 0x219   :  { %540 = vst [vmem:[%s973_s5 + $0x8] sm:$0xff] %v538_v36 }
 0x21a   :  { %545 = vsyncpa [#allocation4], 1 }
 0x21b   :  { %546 = vsyncpa [#allocation6], 1 }

</bundles_post_ra>
